<compile_context>
chip_gen: v7x
topology: tpu7x:2x2x1
jax: 0.10.0
libtpu: 0.0.40
codegen_flags: <defaults>
</compile_context>

<pallas_src>
import functools

import jax
import jax.numpy as jnp
import numpy as np
from jax.experimental import pallas as pl
from jax.experimental.pallas import tpu as pltpu


def make_sincos_table(max_len: int, embed_size: int, dtype=jnp.float32):
    """Deterministic parameter setup, mirrors Position.__init__ (plain JAX glue)."""
    pos = jnp.arange(max_len, dtype=jnp.float32).reshape(-1, 1)          # (max_len, 1)
    div = jnp.power(1000.0,
                    jnp.arange(0, embed_size, 2, dtype=jnp.float32) / embed_size)
    ang = pos / div                                                      # (max_len, E//2)
    P = jnp.zeros((max_len, embed_size), dtype=jnp.float32)
    P = P.at[:, 0::2].set(jnp.sin(ang))
    P = P.at[:, 1::2].set(jnp.cos(ang))
    return P.astype(dtype)


# ---------------------------------------------------------------------------
# Tile selection (lane-dense, ~2 MiB blocks; (8, 128)-aligned or full-dim)
# ---------------------------------------------------------------------------
def _choose_tiles(n_rows, n_cols, itemsize, target_block_bytes=2 * 1024 * 1024):
    # Lane (last-dim) tile: multiple of 128 (or full width) -> unmasked stores.
    max_cols = max(128, target_block_bytes // (8 * itemsize))
    if n_cols <= max_cols or n_cols % 128 != 0:
        tile_c = n_cols
    else:
        tile_c = 128
        cand = (max_cols // 128) * 128
        while cand >= 128:
            if n_cols % cand == 0:
                tile_c = cand
                break
            cand -= 128
    # Sublane (row) tile: multiple of 8 (or full height).
    rows_fit = max(1, target_block_bytes // (tile_c * itemsize))
    if n_rows <= 8 or n_rows <= rows_fit:
        tile_b = n_rows
    else:
        tile_b = max(8, (min(rows_fit, n_rows) // 8) * 8)
    return tile_b, tile_c


# ---------------------------------------------------------------------------
# Kernels
# ---------------------------------------------------------------------------
def _add_pos_kernel(x_ref, p_ref, o_ref):
    # eval-mode forward: X + P (dropout is identity in eval).
    # p_ref is (1, tile_c); broadcast along sublanes is implicit and cheap.
    o_ref[...] = x_ref[...] + p_ref[...]


def _add_pos_dropout_kernel(seed_ref, x_ref, p_ref, o_ref, *,
                            keep_prob: float, tile_b: int, tile_c: int,
                            n_cols: int):
    # training-mode forward: inverted dropout on (X + P), p = 1 - keep_prob.
    x = (x_ref[...] + p_ref[...]).astype(jnp.float32)

    # Global element coordinates of this block (grid = (col_tiles, row_tiles)).
    rows = jax.lax.broadcasted_iota(jnp.int32, x.shape, 0) + pl.program_id(1) * tile_b
    cols = jax.lax.broadcasted_iota(jnp.int32, x.shape, 1) + pl.program_id(0) * tile_c
    idx = (rows * n_cols + cols).astype(jnp.uint32)

    # Stateless counter-based hash (murmur3 finalizer) -> uniform u32.
    h = idx + seed_ref[0].astype(jnp.uint32) * jnp.uint32(0x9E3779B9)
    h = h ^ (h >> 16)
    h = h * jnp.uint32(0x85EBCA6B)
    h = h ^ (h >> 13)
    h = h * jnp.uint32(0xC2B2AE35)
    h = h ^ (h >> 16)

    # keep w.p. keep_prob: single unsigned integer compare (no int->float).
    thresh = jnp.uint32(min(int(round(keep_prob * 4294967296.0)), 4294967295))
    keep = (h < thresh).astype(jnp.float32)
    o_ref[...] = (x * (keep * (1.0 / keep_prob))).astype(o_ref.dtype)


# ---------------------------------------------------------------------------
# Wrapper
# ---------------------------------------------------------------------------
def position_forward(x, P, *, dropout_p=0.2, training=False, seed=0):
    """x: (B, S, E), P: (max_len, E). Returns (B, S, E).

    NOTE: the dropout mask is a deterministic function of (seed, element index);
    callers should fold a step counter into `seed` so masks differ per step.
    """
    B, S, E = x.shape
    SE = S * E
    x2 = x.reshape(B, SE)                               # lane-dense 2-D view
    p2 = P[:S, :].reshape(1, SE).astype(x.dtype)

    itemsize = jnp.dtype(x.dtype).itemsize
    tile_b, tile_c = _choose_tiles(B, SE, itemsize)
    n_b = pl.cdiv(B, tile_b)
    n_c = pl.cdiv(SE, tile_c)
    out_shape = jax.ShapeDtypeStruct((B, SE), x.dtype)

    x_spec = pl.BlockSpec((tile_b, tile_c), lambda c, b: (b, c))
    p_spec = pl.BlockSpec((1, tile_c), lambda c, b: (0, c))   # resident across rows
    o_spec = pl.BlockSpec((tile_b, tile_c), lambda c, b: (b, c))

    if (not training) or dropout_p <= 0.0:
        out2 = pl.pallas_call(
            _add_pos_kernel,
            out_shape=out_shape,
            grid_spec=pltpu.PrefetchScalarGridSpec(
                num_scalar_prefetch=0,
                grid=(n_c, n_b),
                in_specs=[x_spec, p_spec],
                out_specs=o_spec,
            ),
            compiler_params=pltpu.CompilerParams(
                dimension_semantics=("parallel", "parallel")),
        )(x2, p2)
        return out2.reshape(B, S, E)

    keep_prob = 1.0 - float(dropout_p)
    if keep_prob <= 0.0:                                # dropout_p == 1.0
        return jnp.zeros_like(x)

    kern = functools.partial(_add_pos_dropout_kernel, keep_prob=keep_prob,
                             tile_b=tile_b, tile_c=tile_c, n_cols=SE)
    seed_arr = jnp.asarray([seed], dtype=jnp.int32)

    # index_maps receive the scalar-prefetch ref as a trailing positional arg.
    x_spec_t = pl.BlockSpec((tile_b, tile_c), lambda c, b, s: (b, c))
    p_spec_t = pl.BlockSpec((1, tile_c), lambda c, b, s: (0, c))
    o_spec_t = pl.BlockSpec((tile_b, tile_c), lambda c, b, s: (b, c))

    out2 = pl.pallas_call(
        kern,
        out_shape=out_shape,
        grid_spec=pltpu.PrefetchScalarGridSpec(
            num_scalar_prefetch=1,
            grid=(n_c, n_b),
            in_specs=[x_spec_t, p_spec_t],
            out_specs=o_spec_t,
        ),
        compiler_params=pltpu.CompilerParams(
            dimension_semantics=("parallel", "parallel")),
    )(seed_arr, x2, p2)
    return out2.reshape(B, S, E)


# ---------------------------------------------------------------------------
if __name__ == "__main__":
    # Small shapes consistent with the module: (batch, seq_len, embed_size)
    B, S, E = 2, 8, 32
    MAX_LEN = 64
    DROPOUT_P = 0.2

    key = jax.random.PRNGKey(0)
    x = jax.random.normal(key, (B, S, E), dtype=jnp.float32)
    P = make_sincos_table(MAX_LEN, E, dtype=jnp.float32)

    ref = np.asarray(x) + np.asarray(P[:S])[None, :, :]

    # --- eval mode (dropout = identity): check exactly against reference ---
    out_eval = jax.block_until_ready(
        position_forward(x, P, dropout_p=DROPOUT_P, training=False))
    np.testing.assert_allclose(np.asarray(out_eval), ref, rtol=1e-6, atol=1e-6)

    # --- training mode (inverted dropout via stateless in-kernel hash) ---
    out_train = jax.block_until_ready(
        position_forward(x, P, dropout_p=DROPOUT_P, training=True, seed=123))
    ot = np.asarray(out_train)
    assert ot.shape == (B, S, E)
    assert np.all(np.isfinite(ot))
    # every surviving element equals (x + P) / keep_prob; dropped elements are 0
    scaled_ref = ref / (1.0 - DROPOUT_P)
    close = np.isclose(ot, scaled_ref, rtol=1e-5, atol=1e-6)
    zero = (ot == 0.0)
    assert np.all(close | zero)
    n_drop = int(zero.sum())
    assert 0 < n_drop < ot.size   # some, but not all, elements dropped

    print("KERNEL_OK")
</pallas_src>

<mosaic_0001>
module attributes {stable_mosaic.version = 11 : i64} {
  func.func @_add_pos_kernel(%arg0: i32, %arg1: i32, %arg2: memref<2x256xf32, #tpu.memory_space<vmem>>, %arg3: memref<1x256xf32, #tpu.memory_space<vmem>>, %arg4: memref<2x256xf32, #tpu.memory_space<vmem>>) attributes {dimension_semantics = [#tpu.dimension_semantics<parallel>, #tpu.dimension_semantics<parallel>], iteration_bounds = array<i64: 1, 1>, scalar_prefetch = 0 : i64, scratch_operands = 0 : i64, tpu.core_type = #tpu.core_type<tc>, window_params = [{transform_indices = @transform_0, window_bounds = array<i64: 2, 256>}, {transform_indices = @transform_1, window_bounds = array<i64: 1, 256>}, {transform_indices = @transform_2, window_bounds = array<i64: 2, 256>}]} {
    %c0 = arith.constant 0 : index
    %c0_0 = arith.constant 0 : index
    %0 = vector.load %arg2[%c0, %c0_0] : memref<2x256xf32, #tpu.memory_space<vmem>>, vector<2x256xf32>
    %c0_1 = arith.constant 0 : index
    %c0_2 = arith.constant 0 : index
    %1 = vector.load %arg3[%c0_1, %c0_2] : memref<1x256xf32, #tpu.memory_space<vmem>>, vector<1x256xf32>
    %2 = vector.broadcast %1 : vector<1x256xf32> to vector<2x256xf32>
    %3 = arith.addf %0, %2 : vector<2x256xf32>
    %c0_3 = arith.constant 0 : index
    %c0_4 = arith.constant 0 : index
    %4 = vector.load %arg4[%c0_3, %c0_4] : memref<2x256xf32, #tpu.memory_space<vmem>>, vector<2x256xf32>
    tpu.vector_store %arg4[%c0_3, %c0_4], %3 {strides = array<i32>} : memref<2x256xf32, #tpu.memory_space<vmem>>, vector<2x256xf32>,
    return
  }
  func.func @transform_0(%arg0: i32, %arg1: i32) -> (i32, i32) {
    %c0_i32 = arith.constant 0 : i32
    return %arg1, %arg0 : i32, i32
  }
  func.func @transform_1(%arg0: i32, %arg1: i32) -> (i32, i32) {
    %c0_i32 = arith.constant 0 : i32
    %c0_i32_0 = arith.constant 0 : i32
    return %c0_i32, %arg0 : i32, i32
  }
  func.func @transform_2(%arg0: i32, %arg1: i32) -> (i32, i32) {
    %c0_i32 = arith.constant 0 : i32
    return %arg1, %arg0 : i32, i32
  }
}

</mosaic_0001>

<bundles_post_ra>
// kernel: tpu_custom_call.1
= control target key start
LH: loop header
LB: loop body
LE: loop exit
PB: predicated region body
PF: predicated region fallthrough
CT: control target
= control target key end

     0   :  { %7 = vsyncpa [#allocation3], 0  ;;  %s157_s0 = inlined_call_operand.hbm [shape: f32[2,256], index: 0, kind: input, shape index: {}]   ;;  %s158_s1 = inlined_call_operand.vmem [shape: f32[1,256], index: 1, kind: input, shape index: {}]   ;;  %s159_s2 = inlined_call_operand.hbm [shape: f32[2,256], index: 2, kind: output, shape index: {}]  }
   0x1   :  { %8 = vsyncpa [#allocation4], 0  ;;  %s112_s9 = smov [#allocation2]   ;;  %s64_s13 = scalar_lea.hbm %s157_s0, 64 }
   0x2   :  { %s15_s10 = sshll.u32 %s112_s9, 4  ;;  %p65_p0 = scmp.ne.s32.totalorder %s157_s0, %s64_s13  ;;  %s16_s10 = int_to_ptr.vmem [resolvable:$true] %s15_s10 }
   0x3   :  { %p68_p1 = scmp.lt.u32.totalorder %s64_s13, %s157_s0 }
   0x5   :  { %p70_p2 = pnand %p68_p1, %p65_p0 }
   0x7   :  { %73 = shalt.err (!%p70_p2)
}
   0x8   :  { %s74_s18 = scalar_lea.vmem %s16_s10, 64  ;;  %p79_p4 = scmp.lt.s32.totalorder %s16_s10, %s16_s10 }
   0x9   :  { %p75_p3 = scmp.ne.s32.totalorder %s16_s10, %s74_s18  ;;  %p80_p5 = scmp.lt.s32.totalorder %s74_s18, %s74_s18 }
   0xb   :  { %p81_p6 = por %p80_p5, %p79_p4 }
   0xd   :  { %p82_p7 = pnand %p81_p6, %p75_p3 }
   0xf   :  { %85 = shalt.err (!%p82_p7)
}
  0x10   :  { %18 = dma.hbm_to_vmem [thread:$0]  %s157_s0, 64, %s16_s10, [#allocation3]  }
  0x11   :  { %108 = dma.done.wait [#allocation3], 64  }
  0x12   :  { %109 = vsyncadd [#allocation3], 4294967232  ;;  %v27_v0 = vlaneseq  ;;  %v113_v1 = vmov 1983009808   ;;  %v25_v7 = vld [vmem:[%s158_s1] sm:$0x3] }
  0x13   :  { %v37_v2 = vunpack.c.l.s4 %v113_v1  ;;  %v24_v12 = vld [vmem:[#allocation2] sm:$0xf]  ;;  %s114_s23 = smov [#allocation5]  }
  0x14   :  { %v28_v3 = vshrl.u32 %v27_v0, 7  ;;  %s52_s0 = sshll.u32 %s114_s23, 4  ;;  %s53_s0 = int_to_ptr.vmem [resolvable:$true] %s52_s0 }
  0x15   :  { %v38_v6 = vunpack.c.0.s8 %v37_v2  ;;  %s86_s24 = scalar_lea.vmem %s53_s0, 64  ;;  %p91_p9 = scmp.lt.s32.totalorder %s53_s0, %s53_s0 }
  0x16   :  { %v29_v4 = vsub.s32 0, %v28_v3  ;;  %v33_v5 = vsub.s32 1, %v28_v3  ;;  %p87_p8 = scmp.ne.s32.totalorder %s53_s0, %s86_s24  ;;  %p92_p10 = scmp.lt.s32.totalorder %s86_s24, %s86_s24 }
  0x17   :  { %v41_v10 = vsub.s32 %v38_v6, %v28_v3 }
  0x18   :  { %v30_v8 = vrot.slane %v25_v7, %v29_v4  ;;  %v34_v9 = vrot.slane %v25_v7, %v33_v5  ;;  %p93_p11 = por %p92_p10, %p91_p9 }
  0x1a   :  { %v35_v11 = vcombine.low %v30_v8, %v34_v9  ;;  %p94_p12 = pnand %p93_p11, %p87_p8 }
  0x1c   :  { %v42_v13 = vrot.slane %v35_v11, %v41_v10 }
  0x1e   :  { %v44_v14 = vadd.f32 %v42_v13, %v24_v12 }
  0x20   :  { %45 = vst [vmem:[#allocation5] sm:$0xf] %v44_v14 }
  0x21   :  { %97 = shalt.err (!%p94_p12)
}
  0x22   :  { %s98_s26 = scalar_lea.hbm %s159_s2, 64 }
  0x23   :  { %p99_p13 = scmp.ne.s32.totalorder %s159_s2, %s98_s26  ;;  %p102_p0 = scmp.lt.u32.totalorder %s98_s26, %s159_s2 }
  0x25   :  { %p104_p1 = pnand %p102_p0, %p99_p13 }
  0x27   :  { %107 = shalt.err (!%p104_p1)
}
  0x28   :  { %55 = dma.vmem_to_hbm [thread:$0]  %s53_s0, 64, %s159_s2, [#allocation4]  }
  0x29   :  { %110 = dma.done.wait [#allocation4], 64  }
  0x2a   :  { %111 = vsyncadd [#allocation4], 4294967232 }
  0x2b   :  { %59 = vsyncpa [#allocation3], 1 }
  0x2c   :  { %60 = vsyncpa [#allocation4], 1 }

</bundles_post_ra>
